<compile_context>
chip_gen: v5e
topology: v5e:2x2
jax: 0.10.0
libtpu: 0.0.40
codegen_flags: <defaults>
</compile_context>

<pallas_src>
import functools

import jax
import jax.numpy as jnp
from jax.experimental import pallas as pl
from jax.experimental.pallas import tpu as pltpu


def _round_up(x, m):
    return ((x + m - 1) // m) * m


def _pick_batch_tile(batch, max_tile=4096):
    """Adaptive batch tile (columns on the 128-lane axis).

    Small batches: one tile covering round_up(batch, 128) -> minimal padding
    and a single grid step (per-step fixed cost ~0.35 us dominates this tiny
    network).  Large batches: tiles of up to `max_tile` columns with >= 2
    balanced grid steps so v7x's two TensorCores both get work (on v5e/v6e
    the extra step is noise at these tile sizes).
    """
    padded = _round_up(batch, 128)
    if padded <= max_tile:
        # Split into two equal 128-multiples only when it is free (no extra
        # padding) and each half is big enough that the extra step is noise.
        if padded % 256 == 0 and padded // 2 >= 1024:
            return padded // 2
        return padded
    n_tiles = -(-padded // max_tile)          # >= 2
    return _round_up(-(-padded // n_tiles), 128)


def _mlp_kernel(layer_dims, x_ref, w_ref, b_ref, o_ref):
    """Fused feature-major MLP for one batch tile.

    x_ref: (in_dim, B_tile)   f32 input tile (batch on lanes)
    w_ref: (L, D, D)          zero-padded weight slab; W_l = [l, :out_l, :in_l]
    b_ref: (L, D, 1)          zero-padded bias slab (lane-broadcast in kernel)
    o_ref: (out_dim, B_tile)  f32 output tile (lane-dense store)
    """
    n_layers = len(layer_dims) - 1
    out_dim = layer_dims[-1]
    h = x_ref[...]  # already f32 — no cast

    for l in range(n_layers):
        d_in = layer_dims[l]
        b = b_ref[l]  # (D, 1); padded rows are zero

        if l == 0 and d_in <= 8:
            # Tiny contraction (K = in_dim = 2 for Poisson): do it on the VPU
            # as broadcast-FMAs instead of paying an MXU weight push plus a
            # masked (D, d_in) load.  (D,1)*(1,B) broadcasts to (D,B).
            acc = b
            for j in range(d_in):
                acc = acc + w_ref[0, :, j:j + 1] * h[j:j + 1, :]
            h = acc
        elif l == 0:
            # Genuinely narrow input: slice only the contraction dim.
            h = jnp.dot(w_ref[0, :, :d_in], h,
                        preferred_element_type=jnp.float32) + b
        else:
            # Hidden/output layers at full zero-padded (D, D) width: dense,
            # unmasked loads.  Padded W rows/cols and b rows are zero and
            # tanh(0)=0, so padded rows of h stay zero and cannot leak.
            h = jnp.dot(w_ref[l], h, preferred_element_type=jnp.float32) + b

        if l < n_layers - 1:
            h = jnp.tanh(h)  # EUP, full 128-lane f32 vregs

    o_ref[...] = h[:out_dim, :]  # lane-dense f32 store


def poisson_pinn_forward(x, weights, biases, *, batch_tile=None):
    """Forward pass of PoissonPINN.

    x:       (batch, layers[0])        float32
    weights: list of (out_i, in_i)     float32 (PyTorch nn.Linear convention)
    biases:  list of (out_i,)          float32
    returns: (batch, layers[-1])       float32
    """
    n_layers = len(weights)
    layer_dims = tuple([weights[0].shape[1]] + [w.shape[0] for w in weights])
    in_dim, out_dim = layer_dims[0], layer_dims[-1]
    batch = x.shape[0]
    D = max(layer_dims)

    if batch_tile is None:
        batch_tile = _pick_batch_tile(batch)
    else:
        batch_tile = max(128, _round_up(batch_tile, 128))
        batch_tile = min(batch_tile, _round_up(batch, 128))

    num_tiles = pl.cdiv(_round_up(batch, 128), batch_tile)
    padded_batch = num_tiles * batch_tile

    # ---- glue (XLA side, tiny) ------------------------------------------
    # Feature-major input written once into a pre-zeroed padded buffer
    # (single pass; batch-padding columns are zero -> finite through tanh
    # and sliced off at the end).
    x_fm = jnp.zeros((in_dim, padded_batch), jnp.float32)
    x_fm = x_fm.at[:, :batch].set(x.astype(jnp.float32).T)

    # Packed, zero-padded weight slab (L, D, D) and bias slab (L, D, 1).
    # Both have constant index maps -> DMA'd once, VMEM-resident (~13 KiB
    # for weights + a few hundred bytes for biases at D=32).
    w_slab = jnp.zeros((n_layers, D, D), jnp.float32)
    b_slab = jnp.zeros((n_layers, D, 1), jnp.float32)
    for i, (w, b) in enumerate(zip(weights, biases)):
        w_slab = w_slab.at[i, :w.shape[0], :w.shape[1]].set(w.astype(jnp.float32))
        b_slab = b_slab.at[i, :b.shape[0], 0].set(b.astype(jnp.float32))

    kernel = functools.partial(_mlp_kernel, layer_dims)

    flops = 2 * padded_batch * sum(
        layer_dims[i] * layer_dims[i + 1] for i in range(n_layers)
    )
    transcendentals = padded_batch * sum(layer_dims[1:-1])
    bytes_accessed = 4 * (
        in_dim * padded_batch + out_dim * padded_batch + w_slab.size + b_slab.size
    )

    out_fm = pl.pallas_call(
        kernel,
        out_shape=jax.ShapeDtypeStruct((out_dim, padded_batch), jnp.float32),
        grid=(num_tiles,),
        in_specs=[
            # x tile: batch on lanes, pipelined over the grid.
            pl.BlockSpec((in_dim, batch_tile), lambda i: (0, i)),
            # Weight slab: constant block index -> DMA'd once, resident.
            pl.BlockSpec((n_layers, D, D), lambda i: (0, 0, 0)),
            # Bias slab: constant block index -> resident; independent of
            # batch_tile so VMEM footprint doesn't grow with the tile.
            pl.BlockSpec((n_layers, D, 1), lambda i: (0, 0, 0)),
        ],
        out_specs=pl.BlockSpec((out_dim, batch_tile), lambda i: (0, i)),
        compiler_params=pltpu.CompilerParams(
            dimension_semantics=("parallel",),  # megacore-shardable on v7x
        ),
        cost_estimate=pl.CostEstimate(
            flops=flops,
            transcendentals=transcendentals,
            bytes_accessed=bytes_accessed,
        ),
    )(x_fm, w_slab, b_slab)

    out = out_fm[:, :batch]
    if out_dim == 1:
        return out.reshape(batch, 1)  # free reshape of (1, batch)
    return out.T


def init_params(key, layers):
    """Deterministic init matching nn.Linear default shapes:
    weight (out, in), bias (out,), U(-1/sqrt(in), 1/sqrt(in))."""
    weights, biases = [], []
    for i in range(len(layers) - 1):
        fan_in, fan_out = layers[i], layers[i + 1]
        key, kw, kb = jax.random.split(key, 3)
        bound = 1.0 / jnp.sqrt(jnp.float32(fan_in))
        weights.append(
            jax.random.uniform(
                kw, (fan_out, fan_in), jnp.float32, minval=-bound, maxval=bound
            )
        )
        biases.append(
            jax.random.uniform(
                kb, (fan_out,), jnp.float32, minval=-bound, maxval=bound
            )
        )
    return weights, biases


def reference_forward(x, weights, biases):
    """Pure-JAX reference mirroring nn.Sequential(Linear, Tanh, ..., Linear)."""
    h = x
    for i, (w, b) in enumerate(zip(weights, biases)):
        h = h @ w.T + b
        if i < len(weights) - 1:
            h = jnp.tanh(h)
    return h


if __name__ == "__main__":
    # PoissonPINN(layers=[2, 32, 32, 1], activation=nn.Tanh())
    layers = [2, 32, 32, 1]

    key = jax.random.PRNGKey(0)
    key, kx1, kx2 = jax.random.split(key, 3)
    weights, biases = init_params(key, layers)

    fwd = jax.jit(poisson_pinn_forward)

    # Case 1: batch=600 -> adaptive tile 640, single grid step (~6% padding).
    batch1 = 600
    x1 = jax.random.normal(kx1, (batch1, layers[0]), dtype=jnp.float32)
    u1 = jax.block_until_ready(fwd(x1, weights, biases))
    u1_ref = reference_forward(x1, weights, biases)
    assert u1.shape == (batch1, layers[-1])
    assert jnp.allclose(u1, u1_ref, atol=1e-5, rtol=1e-5), (u1, u1_ref)

    # Case 2: batch=2000 -> padded 2048, two tiles of 1024 (exercises the
    # multi-step / v7x megacore path and batch padding).
    batch2 = 2000
    x2 = jax.random.normal(kx2, (batch2, layers[0]), dtype=jnp.float32)
    u2 = jax.block_until_ready(fwd(x2, weights, biases))
    u2_ref = reference_forward(x2, weights, biases)
    assert u2.shape == (batch2, layers[-1])
    assert jnp.allclose(u2, u2_ref, atol=1e-5, rtol=1e-5), (u2, u2_ref)

    print("KERNEL_OK")
</pallas_src>

<mosaic_0001>
module attributes {stable_mosaic.version = 11 : i64} {
  func.func @_mlp_kernel(%arg0: i32, %arg1: memref<2x640xf32, #tpu.memory_space<vmem>>, %arg2: memref<3x32x32xf32, #tpu.memory_space<vmem>>, %arg3: memref<3x32x1xf32, #tpu.memory_space<vmem>>, %arg4: memref<1x640xf32, #tpu.memory_space<vmem>>) attributes {dimension_semantics = [#tpu.dimension_semantics<parallel>], iteration_bounds = array<i64: 1>, scalar_prefetch = 0 : i64, scratch_operands = 0 : i64, tpu.core_type = #tpu.core_type<tc>, window_params = [{transform_indices = @transform_0, window_bounds = array<i64: 2, 640>}, {pipeline_mode = #tpu.pipeline_mode<synchronous>, transform_indices = @transform_1, window_bounds = array<i64: 3, 32, 32>}, {pipeline_mode = #tpu.pipeline_mode<synchronous>, transform_indices = @transform_2, window_bounds = array<i64: 3, 32, 1>}, {transform_indices = @transform_3, window_bounds = array<i64: 1, 640>}]} {
    %c0 = arith.constant 0 : index
    %c0_0 = arith.constant 0 : index
    %0 = vector.load %arg1[%c0, %c0_0] : memref<2x640xf32, #tpu.memory_space<vmem>>, vector<2x640xf32>
    %c0_1 = arith.constant 0 : index
    %c0_2 = arith.constant 0 : index
    %c0_3 = arith.constant 0 : index
    %1 = vector.load %arg3[%c0_1, %c0_2, %c0_3] : memref<3x32x1xf32, #tpu.memory_space<vmem>>, vector<1x32x1xf32>
    %2 = vector.shape_cast %1 : vector<1x32x1xf32> to vector<32x1xf32>
    %c0_4 = arith.constant 0 : index
    %c0_5 = arith.constant 0 : index
    %c0_6 = arith.constant 0 : index
    %3 = vector.load %arg2[%c0_4, %c0_5, %c0_6] : memref<3x32x32xf32, #tpu.memory_space<vmem>>, vector<1x32x1xf32>
    %4 = vector.shape_cast %3 : vector<1x32x1xf32> to vector<32x1xf32>
    %5 = vector.extract_strided_slice %0 {offsets = [0, 0], sizes = [1, 640], strides = [1, 1]} : vector<2x640xf32> to vector<1x640xf32>
    %6 = vector.broadcast %4 : vector<32x1xf32> to vector<32x640xf32>
    %7 = vector.broadcast %5 : vector<1x640xf32> to vector<32x640xf32>
    %8 = arith.mulf %6, %7 : vector<32x640xf32>
    %9 = vector.broadcast %2 : vector<32x1xf32> to vector<32x640xf32>
    %10 = arith.addf %9, %8 : vector<32x640xf32>
    %c0_7 = arith.constant 0 : index
    %c0_8 = arith.constant 0 : index
    %c1 = arith.constant 1 : index
    %11 = vector.load %arg2[%c0_7, %c0_8, %c1] : memref<3x32x32xf32, #tpu.memory_space<vmem>>, vector<1x32x1xf32>
    %12 = vector.shape_cast %11 : vector<1x32x1xf32> to vector<32x1xf32>
    %13 = vector.extract_strided_slice %0 {offsets = [1, 0], sizes = [1, 640], strides = [1, 1]} : vector<2x640xf32> to vector<1x640xf32>
    %14 = vector.broadcast %12 : vector<32x1xf32> to vector<32x640xf32>
    %15 = vector.broadcast %13 : vector<1x640xf32> to vector<32x640xf32>
    %16 = arith.mulf %14, %15 : vector<32x640xf32>
    %17 = arith.addf %10, %16 : vector<32x640xf32>
    %18 = math.tanh %17 : vector<32x640xf32>
    %c1_9 = arith.constant 1 : index
    %c0_10 = arith.constant 0 : index
    %c0_11 = arith.constant 0 : index
    %19 = vector.load %arg3[%c1_9, %c0_10, %c0_11] : memref<3x32x1xf32, #tpu.memory_space<vmem>>, vector<1x32x1xf32>
    %20 = vector.shape_cast %19 : vector<1x32x1xf32> to vector<32x1xf32>
    %c1_12 = arith.constant 1 : index
    %c0_13 = arith.constant 0 : index
    %c0_14 = arith.constant 0 : index
    %21 = vector.load %arg2[%c1_12, %c0_13, %c0_14] : memref<3x32x32xf32, #tpu.memory_space<vmem>>, vector<1x32x32xf32>
    %22 = vector.shape_cast %21 : vector<1x32x32xf32> to vector<32x32xf32>
    %cst = arith.constant dense<0.000000e+00> : vector<32x640xf32>
    %23 = tpu.matmul %22, %18, %cst {dimension_numbers = #tpu.dot_dimension_numbers<[1], [0], [0], [1], [0, 0, 1, 1], [], []>} : vector<32x32xf32>, vector<32x640xf32>, vector<32x640xf32> -> vector<32x640xf32>
    %24 = vector.broadcast %20 : vector<32x1xf32> to vector<32x640xf32>
    %25 = arith.addf %23, %24 : vector<32x640xf32>
    %26 = math.tanh %25 : vector<32x640xf32>
    %c2 = arith.constant 2 : index
    %c0_15 = arith.constant 0 : index
    %c0_16 = arith.constant 0 : index
    %27 = vector.load %arg3[%c2, %c0_15, %c0_16] : memref<3x32x1xf32, #tpu.memory_space<vmem>>, vector<1x32x1xf32>
    %28 = vector.shape_cast %27 : vector<1x32x1xf32> to vector<32x1xf32>
    %c2_17 = arith.constant 2 : index
    %c0_18 = arith.constant 0 : index
    %c0_19 = arith.constant 0 : index
    %29 = vector.load %arg2[%c2_17, %c0_18, %c0_19] : memref<3x32x32xf32, #tpu.memory_space<vmem>>, vector<1x32x32xf32>
    %30 = vector.shape_cast %29 : vector<1x32x32xf32> to vector<32x32xf32>
    %cst_20 = arith.constant dense<0.000000e+00> : vector<32x640xf32>
    %31 = tpu.matmul %30, %26, %cst_20 {dimension_numbers = #tpu.dot_dimension_numbers<[1], [0], [0], [1], [0, 0, 1, 1], [], []>} : vector<32x32xf32>, vector<32x640xf32>, vector<32x640xf32> -> vector<32x640xf32>
    %32 = vector.broadcast %28 : vector<32x1xf32> to vector<32x640xf32>
    %33 = arith.addf %31, %32 : vector<32x640xf32>
    %34 = vector.extract_strided_slice %33 {offsets = [0, 0], sizes = [1, 640], strides = [1, 1]} : vector<32x640xf32> to vector<1x640xf32>
    %c0_21 = arith.constant 0 : index
    %c0_22 = arith.constant 0 : index
    %35 = vector.load %arg4[%c0_21, %c0_22] : memref<1x640xf32, #tpu.memory_space<vmem>>, vector<1x640xf32>
    tpu.vector_store %arg4[%c0_21, %c0_22], %34 {strides = array<i32>} : memref<1x640xf32, #tpu.memory_space<vmem>>, vector<1x640xf32>,
    return
  }
  func.func @transform_0(%arg0: i32) -> (i32, i32) {
    %c0_i32 = arith.constant 0 : i32
    %c0_i32_0 = arith.constant 0 : i32
    return %c0_i32, %arg0 : i32, i32
  }
  func.func @transform_1(%arg0: i32) -> (i32, i32, i32) {
    %c0_i32 = arith.constant 0 : i32
    %c0_i32_0 = arith.constant 0 : i32
    %c0_i32_1 = arith.constant 0 : i32
    %c0_i32_2 = arith.constant 0 : i32
    return %c0_i32, %c0_i32_0, %c0_i32_1 : i32, i32, i32
  }
  func.func @transform_2(%arg0: i32) -> (i32, i32, i32) {
    %c0_i32 = arith.constant 0 : i32
    %c0_i32_0 = arith.constant 0 : i32
    %c0_i32_1 = arith.constant 0 : i32
    %c0_i32_2 = arith.constant 0 : i32
    return %c0_i32, %c0_i32_0, %c0_i32_1 : i32, i32, i32
  }
  func.func @transform_3(%arg0: i32) -> (i32, i32) {
    %c0_i32 = arith.constant 0 : i32
    %c0_i32_0 = arith.constant 0 : i32
    return %c0_i32, %arg0 : i32, i32
  }
}

</mosaic_0001>

<bundles_post_ra>
// kernel: poisson_pinn_forward.1
= control target key start
LH: loop header
LB: loop body
LE: loop exit
PB: predicated region body
PF: predicated region fallthrough
CT: control target
= control target key end

     0   :  { %v771_v0 = vmov 0   ;;  %v772_v6 = vmov 1   ;;  %vm242_vm0 = vcmask 261120   ;;  %vm598_vm1 = vcmask 1040384   ;;  %s1045_s2 = inlined_call_operand.vmem [shape: f32[3,32,1], index: 2, kind: input, shape index: {}]   ;;  %s1046_s1 = inlined_call_operand.vmem [shape: f32[3,32,32], index: 1, kind: input, shape index: {}]   ;;  %s1047_s0 = inlined_call_operand.vmem [shape: f32[2,640], index: 0, kind: input, shape index: {}]   ;;  %s1048_s3 = inlined_call_operand.vmem [shape: f32[1,640], index: 3, kind: output, shape index: {}]  }
   0x1   :  { %685 = vset.pattern.permute.xlu2 %v771_v0  ;;  %683 = vset.pattern.permute.xlu1 %v771_v0  ;;  %v19_v1 = vld [vmem:[%s1045_s2 + $0x18] sm:$0xff]  ;;  %v21_v3 = vld [vmem:[%s1046_s1 + $0x8] sm:$0xff]  ;;  %v22_v4 = vld [vmem:[%s1046_s1 + $0x10] sm:$0xff]  ;;  %vm602_vm2 = vcmask 1043459   ;;  %vm600_vm3 = vcmask 1041408   ;;  %vm604_vm4 = vcmask 1042432  }
   0x2   :  { %v23_v2 = vld [vmem:[%s1046_s1 + $0x18] sm:$0xff]  ;;  %682 = vset.pattern.permute.xlu0 %v771_v0  ;;  %98 = vperm.xlu1 %683, %v19_v1   ;;  %v18_v5 = vld [vmem:[%s1045_s2 + $0x10] sm:$0xff]  ;;  %v17_v7 = vld [vmem:[%s1045_s2 + $0x8] sm:$0xff] }
   0x3   :  { %41 = vperm.xlu0 %682, %v23_v2   ;;  %31 = vperm.xlu2 %685, %v21_v3   ;;  %v20_v8 = vld [vmem:[%s1046_s1] sm:$0xff]  ;;  %v618_v10 = vld [vmem:[%s1045_s2 + $0x30] sm:$0xff]  ;;  %v15_v30 = vld [vmem:[%s1047_s0 + $0x8] sm:$0x3] }
   0x4   :  { %v16_v9 = vld [vmem:[%s1045_s2] sm:$0xff]  ;;  %v50_v38 = vperm.slane %v15_v30, 0  ;;  %v141_v44 = vperm.slane %v15_v30, 1 }
   0x5   :  { %v644_v11 = vld [vmem:[%s1045_s2 + $0x40] sm:$0xff] }
   0x6   :  { %v14_v12 = vld [vmem:[%s1047_s0] sm:$0xff]  ;;  %v857_v46 = vperm.slane %v50_v38, 0  ;;  %v874_v59 = vperm.slane %v141_v44, 1 }
   0x7   :  { %v46_v14 = vperm.slane %v14_v12, 0  ;;  %v47_v15 = vperm.slane %v14_v12, 2  ;;  %v137_v20 = vperm.slane %v14_v12, 1  ;;  %v138_v21 = vperm.slane %v14_v12, 3  ;;  %v616_v44 = vld [vmem:[%s1045_s2 + $0x20] sm:$0xff] }
   0x8   :  { %v48_v28 = vperm.slane %v14_v12, 4  ;;  %v49_v35 = vperm.slane %v14_v12, 6  ;;  %v139_v40 = vperm.slane %v14_v12, 5  ;;  %v140_v41 = vperm.slane %v14_v12, 7 }
   0x9   :  { %v828_v18 = vperm.slane %v46_v14, 0  ;;  %v830_v19 = vperm.slane %v47_v15, 0  ;;  %v834_v24 = vperm.slane %v137_v20, 1  ;;  %v836_v25 = vperm.slane %v138_v21, 1 }
   0xa   :  { %684 = vset.pattern.permute.xlu1 %v772_v6  ;;  %v849_v39 = vperm.slane %v48_v28, 0  ;;  %v855_v45 = vperm.slane %v49_v35, 0  ;;  %v862_v49 = vperm.slane %v139_v40, 1  ;;  %v864_v50 = vperm.slane %v140_v41, 1 }
   0xb   :  { %36 = vperm.xlu0 %682, %v22_v4   ;;  %93 = vperm.xlu2 %685, %v18_v5   ;;  %v619_v5 = vld [vmem:[%s1045_s2 + $0x38] sm:$0xff] }
   0xc   :  { %134 = vperm.xlu1 %684, %v23_v2  }
  0x13   :  { %686 = vset.pattern.permute.xlu0 %v772_v6  ;;  %88 = vperm.xlu2 %685, %v17_v7  }
  0x14   :  { %687 = vset.pattern.permute.xlu1 %v771_v0  ;;  %130 = vperm.xlu0 %686, %v22_v4  }
  0x15   :  { %26 = vperm.xlu1 %687, %v20_v8  }
  0x1b   :  { %83 = vperm.xlu2 %685, %v16_v9  }
  0x1c   :  { %122 = vperm.xlu0 %686, %v20_v8  }
  0x1d   :  { %688 = vset.pattern.permute.xlu1 %v772_v6 }
  0x1e   :  { %126 = vperm.xlu1 %688, %v21_v3  }
  0x23   :  { %234 = vperm.xlu2 %685, %v618_v10  }
  0x24   :  { %690 = vset.pattern.permute.xlu0 %v771_v0 }
  0x26   :  { %689 = vset.pattern.permute.xlu1 %v771_v0 }
  0x27   :  { %239 = vperm.xlu1 %689, %v619_v5  }
  0x2b   :  { %432 = vperm.xlu2 %685, %v644_v11  }
  0x2f   :  { %224 = vperm.xlu1 %689, %v616_v44  }
  0x5d   :  { %v32_v13 = vpop.permute.xlu2 %31 }
  0x5e   :  { %v66_v57 = vmul.f32 %v828_v18, %v32_v13  ;;  %v67_v58 = vmul.f32 %v830_v19, %v32_v13  ;;  %v68_v61 = vmul.f32 %v849_v39, %v32_v13  ;;  %v69_v2 = vmul.f32 %v855_v45, %v32_v13 }
  0x5f   :  { %v885_v6 = vmul.f32 %v857_v46, %v32_v13 }
  0x65   :  { %v838_v26 = vpop.permute.xlu2 %93 }
  0x6d   :  { %v859_v47 = vpop.permute.xlu2 %88 }
  0x6e   :  { %v106_v12 = vadd.f32 %v859_v47, %v66_v57  ;;  %v107_v13 = vadd.f32 %v859_v47, %v67_v58  ;;  %v109_v28 = vadd.f32 %v859_v47, %v69_v2 }
  0x74   :  { %v826_v16 = vpop.permute.xlu1 %98 }
  0x75   :  { %v42_v17 = vpop.permute.xlu0 %41 }
  0x76   :  { %v76_v22 = vmul.f32 %v828_v18, %v42_v17  ;;  %v77_v23 = vmul.f32 %v830_v19, %v42_v17  ;;  %v78_v48 = vmul.f32 %v849_v39, %v42_v17  ;;  %v79_v62 = vmul.f32 %v855_v45, %v42_v17 }
  0x77   :  { %v80_v3 = vmul.f32 %v857_v46, %v42_v17  ;;  %v108_v17 = vadd.f32 %v859_v47, %v68_v61 }
  0x78   :  { %v116_v33 = vadd.f32 %v826_v16, %v76_v22  ;;  %v117_v34 = vadd.f32 %v826_v16, %v77_v23  ;;  %v118_v8 = vadd.f32 %v826_v16, %v78_v48  ;;  %v119_v15 = vadd.f32 %v826_v16, %v79_v62 }
  0x79   :  { %v120_v23 = vadd.f32 %v826_v16, %v80_v3 }
  0x7d   :  { %v840_v27 = vpop.permute.xlu0 %36 }
  0x7e   :  { %v135_v29 = vpop.permute.xlu1 %134  ;;  %v71_v42 = vmul.f32 %v828_v18, %v840_v27  ;;  %v72_v43 = vmul.f32 %v830_v19, %v840_v27  ;;  %v73_v9 = vmul.f32 %v849_v39, %v840_v27  ;;  %v74_v10 = vmul.f32 %v855_v45, %v840_v27 }
  0x7f   :  { %v167_v31 = vmul.f32 %v834_v24, %v135_v29  ;;  %v168_v32 = vmul.f32 %v836_v25, %v135_v29  ;;  %v169_v4 = vmul.f32 %v862_v49, %v135_v29  ;;  %v170_v7 = vmul.f32 %v864_v50, %v135_v29 }
  0x80   :  { %v111_v55 = vadd.f32 %v838_v26, %v71_v42  ;;  %v112_v56 = vadd.f32 %v838_v26, %v72_v43  ;;  %v171_v11 = vmul.f32 %v874_v59, %v135_v29  ;;  %v75_v29 = vmul.f32 %v857_v46, %v840_v27 }
  0x81   :  { %v187_v36 = vadd.f32 %v167_v31, %v116_v33  ;;  %v188_v37 = vadd.f32 %v168_v32, %v117_v34  ;;  %v189_v22 = vadd.f32 %v169_v4, %v118_v8  ;;  %v190_v31 = vadd.f32 %v170_v7, %v119_v15 }
  0x82   :  { %v191_v34 = vadd.f32 %v171_v11, %v120_v23  ;;  %v113_v35 = vadd.f32 %v838_v26, %v73_v9  ;;  %v622_v11 = vld [vmem:[%s1046_s1 + $0x30] sm:$0xff] }
  0x83   :  { %691 = vtanh.f32 %v187_v36 }
  0x84   :  { %693 = vtanh.f32 %v188_v37 }
  0x86   :  { %v131_v51 = vpop.permute.xlu0 %130 }
  0x87   :  { %v162_v52 = vmul.f32 %v834_v24, %v131_v51  ;;  %v163_v53 = vmul.f32 %v836_v25, %v131_v51  ;;  %v868_v54 = vpop.permute.xlu1 %26  ;;  %v164_v16 = vmul.f32 %v862_v49, %v131_v51  ;;  %v165_v41 = vmul.f32 %v864_v50, %v131_v51 }
  0x88   :  { %v61_v14 = vmul.f32 %v828_v18, %v868_v54  ;;  %v62_v20 = vmul.f32 %v830_v19, %v868_v54  ;;  %v84_v18 = vpop.permute.xlu2 %83  ;;  %v114_v19 = vadd.f32 %v838_v26, %v74_v10  ;;  %v166_v42 = vmul.f32 %v874_v59, %v131_v51  ;;  %v620_v10 = vld [vmem:[%s1046_s1 + $0x20] sm:$0xff] }
  0x89   :  { %v692_v60 = vpop.eup %691  ;;  %v182_v63 = vadd.f32 %v162_v52, %v111_v55  ;;  %v183_v0 = vadd.f32 %v163_v53, %v112_v56  ;;  %v115_v51 = vadd.f32 %v838_v26, %v75_v29  ;;  %v63_v55 = vmul.f32 %v849_v39, %v868_v54  ;;  %v621_v29 = vld [vmem:[%s1046_s1 + $0x28] sm:$0xff] }
  0x8a   :  { %v694_v1 = vpop.eup %693  ;;  %267 = vmatpush.msra.mxu0 %v692_v60  ;;  %672 = vmatpush.msra.mxu2 %v692_v60  ;;  %v101_v27 = vadd.f32 %v84_v18, %v61_v14  ;;  %v102_v43 = vadd.f32 %v84_v18, %v62_v20  ;;  %v184_v57 = vadd.f32 %v164_v16, %v113_v35 }
  0x8b   :  { %296 = vmatpush.msra.mxu1 %v694_v1  ;;  %676 = vmatpush.msra.mxu3 %v694_v1  ;;  %695 = vtanh.f32 %v182_v63  ;;  %v64_v58 = vmul.f32 %v855_v45, %v868_v54  ;;  %v185_v61 = vadd.f32 %v165_v41, %v114_v19  ;;  %v65_v62 = vmul.f32 %v857_v46, %v868_v54  ;;  %v617_v54 = vld [vmem:[%s1045_s2 + $0x28] sm:$0xff] }
  0x8c   :  { %697 = vtanh.f32 %v183_v0  ;;  %v186_v63 = vadd.f32 %v166_v42, %v115_v51  ;;  %v110_v39 = vadd.f32 %v859_v47, %v885_v6  ;;  %v103_v5 = vadd.f32 %v84_v18, %v63_v55  ;;  %229 = vperm.xlu0 %690, %v617_v54  }
  0x8d   :  { %699 = vtanh.f32 %v189_v22 }
  0x8e   :  { %v123_v21 = vpop.permute.xlu0 %122  ;;  %701 = vtanh.f32 %v190_v31 }
  0x8f   :  { %v152_v30 = vmul.f32 %v834_v24, %v123_v21  ;;  %v153_v32 = vmul.f32 %v836_v25, %v123_v21  ;;  %703 = vtanh.f32 %v191_v34  ;;  %v154_v26 = vmul.f32 %v862_v49, %v123_v21 }
  0x90   :  { %v127_v33 = vpop.permute.xlu1 %126  ;;  %v155_v1 = vmul.f32 %v864_v50, %v123_v21  ;;  %v156_v3 = vmul.f32 %v874_v59, %v123_v21 }
  0x91   :  { %v696_v36 = vpop.eup %695  ;;  %v157_v37 = vmul.f32 %v834_v24, %v127_v33  ;;  %v158_v38 = vmul.f32 %v836_v25, %v127_v33  ;;  %v172_v52 = vadd.f32 %v152_v30, %v101_v27  ;;  %v159_v25 = vmul.f32 %v862_v49, %v127_v33  ;;  %v623_v30 = vld [vmem:[%s1046_s1 + $0x38] sm:$0xff] }
  0x92   :  { %v698_v40 = vpop.eup %697  ;;  %268 = vmatpush.msra.mxu0 %v696_v36  ;;  %673 = vmatpush.msra.mxu2 %v696_v36  ;;  %v173_v53 = vadd.f32 %v153_v32, %v102_v43  ;;  %v160_v56 = vmul.f32 %v864_v50, %v127_v33  ;;  %v161_v60 = vmul.f32 %v874_v59, %v127_v33  ;;  %v970_v36 = vpop.permute.xlu2 %234 }
  0x93   :  { %297 = vmatpush.msra.mxu1 %v698_v40  ;;  %677 = vmatpush.msra.mxu3 %v698_v40  ;;  %v177_v48 = vadd.f32 %v157_v37, %v106_v12  ;;  %v178_v24 = vadd.f32 %v158_v38, %v107_v13  ;;  %v700_v0 = vpop.eup %699  ;;  %v179_v2 = vadd.f32 %v159_v25, %v108_v17 }
  0x94   :  { %v702_v45 = vpop.eup %701  ;;  %v180_v4 = vadd.f32 %v160_v56, %v109_v28  ;;  %v181_v46 = vadd.f32 %v161_v60, %v110_v39  ;;  %v104_v49 = vadd.f32 %v84_v18, %v64_v58  ;;  %v174_v47 = vadd.f32 %v154_v26, %v103_v5 }
  0x95   :  { %705 = vtanh.f32 %v177_v48  ;;  %v704_v7 = vpop.eup %703  ;;  %v105_v50 = vadd.f32 %v84_v18, %v65_v62 }
  0x96   :  { %707 = vtanh.f32 %v178_v24  ;;  %v175_v59 = vadd.f32 %v155_v1, %v104_v49 }
  0x97   :  { %709 = vtanh.f32 %v172_v52  ;;  %v176_v12 = vadd.f32 %v156_v3, %v105_v50  ;;  %v996_v3 = vld [vmem:[%s1046_s1 + $0x48] sm:$0xff] }
  0x98   :  { %711 = vtanh.f32 %v173_v53 }
  0x99   :  { %713 = vtanh.f32 %v184_v57  ;;  %v968_v34 = vpop.permute.xlu1 %239 }
  0x9a   :  { %715 = vtanh.f32 %v185_v61 }
  0x9b   :  { %v706_v8 = vpop.eup %705  ;;  %717 = vtanh.f32 %v186_v63  ;;  %v987_v63 = vld [vmem:[%s1046_s1 + $0x40] sm:$0xff] }
  0x9c   :  { %v708_v6 = vpop.eup %707  ;;  %269 = vmatpush.msra.mxu0 %v706_v8  ;;  %674 = vmatpush.msra.mxu2 %v706_v8  ;;  %719 = vtanh.f32 %v179_v2 }
  0x9d   :  { %v710_v9 = vpop.eup %709  ;;  %298 = vmatpush.msra.mxu1 %v708_v6  ;;  %678 = vmatpush.msra.mxu3 %v708_v6  ;;  %721 = vtanh.f32 %v180_v4 }
  0x9e   :  { %v712_v13 = vpop.eup %711  ;;  %270 = vmatpush.msra.mxu0 %v710_v9  ;;  %675 = vmatpush.msra.mxu2 %v710_v9  ;;  %723 = vtanh.f32 %v181_v46 }
  0x9f   :  { %v714_v14 = vpop.eup %713  ;;  %299 = vmatpush.msra.mxu1 %v712_v13  ;;  %679 = vmatpush.msra.mxu3 %v712_v13  ;;  %725 = vtanh.f32 %v174_v47  ;;  %v650_v47 = vld [vmem:[%s1046_s1 + $0x50] sm:$0xff] }
  0xa0   :  { %v716_v15 = vpop.eup %715  ;;  %624 = vmatmul.msk.f32.vlgmr.msra.gmra.mxu0 %vm242_vm0, %v620_v10  ;;  %626 = vmatmul.msk.f32.vlgmr.msra.gmra.mxu2 %vm242_vm0, %v622_v11  ;;  %727 = vtanh.f32 %v175_v59 }
  0xa1   :  { %v718_v17 = vpop.eup %717  ;;  %630 = vmatmul.msk.f32.vlgmr.msra.gmra.mxu3 %vm242_vm0, %v622_v11  ;;  %325 = vmatpush.msrb.mxu2 %v700_v0  ;;  %729 = vtanh.f32 %v176_v12  ;;  %v978_v44 = vpop.permute.xlu1 %224 }
  0xa2   :  { %v720_v20 = vpop.eup %719  ;;  %354 = vmatpush.msrb.mxu3 %v702_v45  ;;  %383 = vmatpush.msrb.mxu0 %v704_v7 }
  0xa3   :  { %v722_v21 = vpop.eup %721  ;;  %326 = vmatpush.msrb.mxu2 %v714_v14  ;;  %628 = vmatmul.msk.f32.vlgmr.msra.gmra.mxu1 %vm242_vm0, %v620_v10 }
  0xa4   :  { %v724_v22 = vpop.eup %723  ;;  %355 = vmatpush.msrb.mxu3 %v716_v15  ;;  %384 = vmatpush.msrb.mxu0 %v718_v17 }
  0xa5   :  { %v726_v23 = vpop.eup %725  ;;  %327 = vmatpush.msrb.mxu2 %v720_v20 }
  0xa6   :  { %v728_v28 = vpop.eup %727  ;;  %356 = vmatpush.msrb.mxu3 %v722_v21  ;;  %385 = vmatpush.msrb.mxu0 %v724_v22  ;;  %v651_v21 = vld [vmem:[%s1046_s1 + $0x58] sm:$0xff] }
  0xa7   :  { %v730_v31 = vpop.eup %729  ;;  %328 = vmatpush.msrb.mxu2 %v726_v23 }
  0xa8   :  { %357 = vmatpush.msrb.mxu3 %v728_v28  ;;  %386 = vmatpush.msrb.mxu0 %v730_v31 }
  0xa9   :  { %625 = vmatmul.msk.f32.gmra.mxu0 %vm242_vm0, %v621_v29  ;;  %627 = vmatmul.msk.f32.gmra.mxu2 %vm242_vm0, %v623_v30 }
  0xaa   :  { %631 = vmatmul.msk.f32.gmra.mxu3 %vm242_vm0, %v623_v30 }
  0xab   :  { %629 = vmatmul.msk.f32.gmra.mxu1 %vm242_vm0, %v621_v29 }
  0xb1   :  { %632 = vmatmul.msk.f32.vlgmr.msrb.gmra.mxu2 %vm242_vm0, %v620_v10  ;;  %640 = vmatmul.msk.f32.vlgmr.msrb.gmra.mxu0 %vm242_vm0, %v620_v10 }
  0xb2   :  { %636 = vmatmul.msk.f32.vlgmr.msrb.gmra.mxu3 %vm242_vm0, %v620_v10 }
  0xb9   :  { %633 = vmatmul.msk.f32.gmra.mxu2 %vm242_vm0, %v621_v29  ;;  %641 = vmatmul.msk.f32.gmra.mxu0 %vm242_vm0, %v621_v29 }
  0xba   :  { %637 = vmatmul.msk.f32.gmra.mxu3 %vm242_vm0, %v621_v29 }
  0xc1   :  { %634 = vmatmul.msk.f32.gmra.mxu2 %vm242_vm0, %v622_v11  ;;  %642 = vmatmul.msk.f32.gmra.mxu0 %vm242_vm0, %v622_v11 }
  0xc2   :  { %638 = vmatmul.msk.f32.gmra.mxu3 %vm242_vm0, %v622_v11 }
  0xc9   :  { %635 = vmatmul.msk.f32.gmra.mxu2 %vm242_vm0, %v623_v30  ;;  %643 = vmatmul.msk.f32.gmra.mxu0 %vm242_vm0, %v623_v30 }
  0xca   :  { %639 = vmatmul.msk.f32.gmra.mxu3 %vm242_vm0, %v623_v30 }
  0xfe   :  { %v974_v38 = vpop.permute.xlu0 %229 }
 0x11d   :  { %v272_v18 = vpop.f32.mrf.mxu0 }
 0x11e   :  { %v273_v25 = vadd.f32 %v272_v18, %v978_v44 }
 0x120   :  { %v301_v32 = vpop.f32.mrf.mxu1 }
 0x121   :  { %v302_v53 = vadd.f32 %v301_v32, %v978_v44 }
 0x123   :  { %v278_v33 = vpop.f32.mrf.mxu2 }
 0x124   :  { %v307_v35 = vpop.f32.mrf.mxu3  ;;  %v279_v16 = vadd.f32 %v278_v33, %v970_v36 }
 0x125   :  { %v308_v37 = vadd.f32 %v307_v35, %v970_v36 }
 0x126   :  { %v275_v19 = vpop.f32.mrf.mxu0  ;;  %731 = vtanh.f32 %v279_v16 }
 0x127   :  { %v276_v43 = vadd.f32 %v275_v19, %v974_v38  ;;  %733 = vtanh.f32 %v308_v37 }
 0x128   :  { %v304_v27 = vpop.f32.mrf.mxu1 }
 0x129   :  { %v305_v52 = vadd.f32 %v304_v27, %v974_v38 }
 0x12c   :  { %v281_v40 = vpop.f32.mrf.mxu2  ;;  %v732_v51 = vpop.eup %731 }
 0x12d   :  { %v282_v41 = vadd.f32 %v281_v40, %v968_v34  ;;  %v310_v42 = vpop.f32.mrf.mxu3  ;;  %v734_v55 = vpop.eup %733 }
 0x12e   :  { %v311_v48 = vadd.f32 %v310_v42, %v968_v34  ;;  %v388_v24 = vpop.f32.mrf.mxu0  ;;  %v433_v40 = vpop.permute.xlu2 %432 }
 0x12f   :  { %735 = vtanh.f32 %v282_v41  ;;  %v389_v8 = vadd.f32 %v388_v24, %v978_v44 }
 0x130   :  { %737 = vtanh.f32 %v311_v48 }
 0x131   :  { %739 = vtanh.f32 %v276_v43 }
 0x132   :  { %741 = vtanh.f32 %v305_v52 }
 0x133   :  { %743 = vtanh.f32 %v273_v25 }
 0x134   :  { %v330_v56 = vpop.f32.mrf.mxu2  ;;  %745 = vtanh.f32 %v302_v53  ;;  %v607_v53 = vlaneseq }
 0x135   :  { %v736_v57 = vpop.eup %735  ;;  %v359_v58 = vpop.f32.mrf.mxu3  ;;  %v331_v17 = vadd.f32 %v330_v56, %v978_v44 }
 0x136   :  { %v738_v60 = vpop.eup %737  ;;  %v391_v61 = vpop.f32.mrf.mxu0  ;;  %471 = vmatpush.msrb.mxu1 %v736_v57  ;;  %v360_v20 = vadd.f32 %v359_v58, %v978_v44  ;;  %vm609_vm5 = vcmp.lt.s32.totalorder %v607_v53, 640 }
 0x137   :  { %v740_v62 = vpop.eup %739  ;;  %497 = vmatpush.msra.mxu2 %v738_v60  ;;  %v392_v54 = vadd.f32 %v391_v61, %v974_v38 }
 0x138   :  { %v742_v26 = vpop.eup %741  ;;  %472 = vmatpush.msrb.mxu1 %v732_v51 }
 0x139   :  { %498 = vmatpush.msra.mxu2 %v734_v55  ;;  %v744_v0 = vpop.eup %743 }
 0x13a   :  { %473 = vmatpush.msrb.mxu1 %v740_v62  ;;  %v746_v39 = vpop.eup %745 }
 0x13b   :  { %499 = vmatpush.msra.mxu2 %v742_v26 }
 0x13c   :  { %v333_v1 = vpop.f32.mrf.mxu2  ;;  %474 = vmatpush.msrb.mxu1 %v744_v0 }
 0x13d   :  { %v362_v2 = vpop.f32.mrf.mxu3  ;;  %500 = vmatpush.msra.mxu2 %v746_v39  ;;  %652 = vmatmul.msk.f32.vlgmr.msrb.gmra.mxu1 %vm242_vm0, %v987_v63  ;;  %v334_v13 = vadd.f32 %v333_v1, %v974_v38 }
 0x13e   :  { %656 = vmatmul.msk.f32.vlgmr.msra.gmra.mxu2 %vm242_vm0, %v987_v63  ;;  %v394_v45 = vpop.f32.mrf.mxu0  ;;  %v363_v14 = vadd.f32 %v362_v2, %v974_v38 }
 0x13f   :  { %v395_v46 = vadd.f32 %v394_v45, %v970_v36 }
 0x144   :  { %v336_v4 = vpop.f32.mrf.mxu2 }
 0x145   :  { %v365_v5 = vpop.f32.mrf.mxu3  ;;  %653 = vmatmul.msk.f32.gmra.mxu1 %vm242_vm0, %v996_v3  ;;  %v337_v6 = vadd.f32 %v336_v4, %v970_v36 }
 0x146   :  { %v397_v7 = vpop.f32.mrf.mxu0  ;;  %657 = vmatmul.msk.f32.gmra.mxu2 %vm242_vm0, %v996_v3  ;;  %v366_v10 = vadd.f32 %v365_v5, %v970_v36 }
 0x147   :  { %v398_v49 = vadd.f32 %v397_v7, %v968_v34 }
 0x149   :  { %747 = vtanh.f32 %v398_v49 }
 0x14a   :  { %749 = vtanh.f32 %v395_v46 }
 0x14b   :  { %751 = vtanh.f32 %v392_v54 }
 0x14c   :  { %v339_v50 = vpop.f32.mrf.mxu2  ;;  %753 = vtanh.f32 %v389_v8 }
 0x14d   :  { %v340_v59 = vadd.f32 %v339_v50, %v968_v34  ;;  %v368_v9 = vpop.f32.mrf.mxu3  ;;  %654 = vmatmul.msk.f32.gmra.mxu1 %vm242_vm0, %v650_v47 }
 0x14e   :  { %v369_v11 = vadd.f32 %v368_v9, %v968_v34  ;;  %658 = vmatmul.msk.f32.gmra.mxu2 %vm242_vm0, %v650_v47 }
 0x14f   :  { %v748_v12 = vpop.eup %747  ;;  %755 = vtanh.f32 %v340_v59 }
 0x150   :  { %757 = vtanh.f32 %v369_v11  ;;  %575 = vmatpush.msra.mxu1 %v748_v12  ;;  %v750_v15 = vpop.eup %749 }
 0x151   :  { %759 = vtanh.f32 %v337_v6  ;;  %v752_v22 = vpop.eup %751 }
 0x152   :  { %761 = vtanh.f32 %v366_v10  ;;  %576 = vmatpush.msra.mxu1 %v750_v15  ;;  %v754_v23 = vpop.eup %753 }
 0x153   :  { %763 = vtanh.f32 %v334_v13 }
 0x154   :  { %765 = vtanh.f32 %v363_v14  ;;  %577 = vmatpush.msra.mxu1 %v752_v22 }
 0x155   :  { %v756_v28 = vpop.eup %755  ;;  %767 = vtanh.f32 %v331_v17  ;;  %655 = vmatmul.msk.f32.gmra.mxu1 %vm242_vm0, %v651_v21 }
 0x156   :  { %v758_v29 = vpop.eup %757  ;;  %769 = vtanh.f32 %v360_v20  ;;  %523 = vmatpush.msra.mxu3 %v756_v28  ;;  %578 = vmatpush.msra.mxu1 %v754_v23 }
 0x157   :  { %v760_v30 = vpop.eup %759  ;;  %549 = vmatpush.msra.mxu0 %v758_v29  ;;  %659 = vmatmul.msk.f32.gmra.mxu2 %vm242_vm0, %v651_v21 }
 0x158   :  { %v762_v31 = vpop.eup %761  ;;  %524 = vmatpush.msra.mxu3 %v760_v30 }
 0x159   :  { %v764_v18 = vpop.eup %763  ;;  %550 = vmatpush.msra.mxu0 %v762_v31 }
 0x15a   :  { %v766_v32 = vpop.eup %765  ;;  %525 = vmatpush.msra.mxu3 %v764_v18 }
 0x15b   :  { %v768_v33 = vpop.eup %767  ;;  %551 = vmatpush.msra.mxu0 %v766_v32 }
 0x15c   :  { %v770_v34 = vpop.eup %769  ;;  %526 = vmatpush.msra.mxu3 %v768_v33 }
 0x15d   :  { %552 = vmatpush.msra.mxu0 %v770_v34  ;;  %660 = vmatmul.msk.f32.vlgmr.msra.gmra.mxu3 %vm242_vm0, %v987_v63 }
 0x15e   :  { %664 = vmatmul.msk.f32.vlgmr.msra.gmra.mxu0 %vm242_vm0, %v987_v63  ;;  %668 = vmatmul.msk.f32.vlgmr.msra.gmra.mxu1 %vm242_vm0, %v987_v63 }
 0x165   :  { %661 = vmatmul.msk.f32.gmra.mxu3 %vm242_vm0, %v996_v3 }
 0x166   :  { %665 = vmatmul.msk.f32.gmra.mxu0 %vm242_vm0, %v996_v3  ;;  %669 = vmatmul.msk.f32.gmra.mxu1 %vm242_vm0, %v996_v3 }
 0x16d   :  { %662 = vmatmul.msk.f32.gmra.mxu3 %vm242_vm0, %v650_v47 }
 0x16e   :  { %666 = vmatmul.msk.f32.gmra.mxu0 %vm242_vm0, %v650_v47  ;;  %670 = vmatmul.msk.f32.gmra.mxu1 %vm242_vm0, %v650_v47 }
 0x175   :  { %663 = vmatmul.msk.f32.gmra.mxu3 %vm242_vm0, %v651_v21 }
 0x176   :  { %667 = vmatmul.msk.f32.gmra.mxu0 %vm242_vm0, %v651_v21  ;;  %671 = vmatmul.msk.f32.gmra.mxu1 %vm242_vm0, %v651_v21 }
 0x1ba   :  { %v476_v35 = vpop.f32.mrf.mxu1 }
 0x1bb   :  { %v477_v57 = vadd.f32 %v476_v35, %v433_v40 }
 0x1c1   :  { %v502_v19 = vpop.f32.mrf.mxu2 }
 0x1c2   :  { %v479_v36 = vpop.f32.mrf.mxu1  ;;  %v503_v44 = vadd.f32 %v502_v19, %v433_v40 }
 0x1c4   :  { %v594_v52 = vrot.slane %v503_v44, 7 }
 0x1c6   :  { %v599_v62 = vsel %vm598_vm1, %v477_v57, %v594_v52 }
 0x1c9   :  { %v505_v16 = vpop.f32.mrf.mxu2 }
 0x1ca   :  { %v481_v37 = vpop.f32.mrf.mxu1 }
 0x1d1   :  { %v507_v38 = vpop.f32.mrf.mxu2 }
 0x1d2   :  { %v483_v27 = vpop.f32.mrf.mxu1 }
 0x1da   :  { %v509_v41 = vpop.f32.mrf.mxu2 }
 0x1db   :  { %v554_v42 = vpop.f32.mrf.mxu0  ;;  %v580_v43 = vpop.f32.mrf.mxu1 }
 0x1dc   :  { %v555_v48 = vadd.f32 %v554_v42, %v433_v40  ;;  %v581_v24 = vadd.f32 %v580_v43, %v433_v40 }
 0x1de   :  { %v596_v51 = vrot.slane %v555_v48, 5  ;;  %v597_v55 = vrot.slane %v581_v24, 4 }
 0x1e0   :  { %v528_v25 = vpop.f32.mrf.mxu3  ;;  %v603_v26 = vsel %vm602_vm2, %v596_v51, %v597_v55 }
 0x1e1   :  { %v529_v56 = vadd.f32 %v528_v25, %v433_v40 }
 0x1e3   :  { %v595_v58 = vrot.slane %v529_v56, 6  ;;  %v557_v60 = vpop.f32.mrf.mxu0  ;;  %v583_v61 = vpop.f32.mrf.mxu1 }
 0x1e5   :  { %v601_v63 = vsel %vm600_vm3, %v599_v62, %v595_v58 }
 0x1e6   :  { %v605_v0 = vsel %vm604_vm4, %v601_v63, %v603_v26 }
 0x1e7   :  { %611 = vst.msk [vmem:[%s1048_s3] sm:$0x1f] %vm609_vm5, %v605_v0 }
 0x1e8   :  { %v531_v39 = vpop.f32.mrf.mxu3 }
 0x1eb   :  { %v559_v1 = vpop.f32.mrf.mxu0  ;;  %v585_v2 = vpop.f32.mrf.mxu1 }
 0x1f0   :  { %v533_v45 = vpop.f32.mrf.mxu3 }
 0x1f3   :  { %v561_v3 = vpop.f32.mrf.mxu0  ;;  %v587_v4 = vpop.f32.mrf.mxu1 }
 0x1f8   :  { %v535_v5 = vpop.f32.mrf.mxu3 }

</bundles_post_ra>
